<compile_context>
chip_gen: v5e
topology: v5e:2x2
jax: 0.10.0
libtpu: 0.0.40
codegen_flags: <defaults>
</compile_context>

<pallas_src>
import functools

import numpy as np

import jax
import jax.numpy as jnp
from jax.experimental import pallas as pl
from jax.experimental.pallas import tpu as pltpu


def _moving_avg_kernel(w_ref, x_ref, o_ref, *, inv_k, precision):
    # w_ref : (L_out, L)       banded multiplicity matrix (exact integers)
    # x_ref : (bt, L, ct)      input block
    # o_ref : (bt, L_out, ct)  output block
    w = w_ref[...]
    bt = x_ref.shape[0]
    for b in range(bt):  # bt <= 32; small unrolled per-row MXU matmuls
        s = jnp.dot(w, x_ref[b],
                    preferred_element_type=jnp.float32,
                    precision=precision)
        o_ref[b] = (s * inv_k).astype(o_ref.dtype)


def _build_weight(L, kernel_size, stride, pad, L_out):
    """Static (L_out, L) multiplicity matrix with replicate padding folded in."""
    w = np.zeros((L_out, L), dtype=np.float32)
    for o in range(L_out):
        base = o * stride - pad
        for k in range(kernel_size):
            j = min(max(base + k, 0), L - 1)
            w[o, j] += 1.0
    return w


def _largest_divisor_leq(n, cap):
    cap = int(max(1, min(n, cap)))
    for d in range(cap, 0, -1):
        if n % d == 0:
            return d
    return 1


def _vmem_budget():
    # Generation-aware sizing: v7x has 64 MiB VMEM per TensorCore, v5e/v6e 128 MiB.
    try:
        cap = int(getattr(pltpu.get_tpu_info(), "vmem_capacity_bytes",
                          128 * 1024 * 1024))
    except Exception:
        cap = 128 * 1024 * 1024
    if cap <= 64 * 1024 * 1024:
        return 4 * 1024 * 1024, 48 * 1024 * 1024   # v7x-class: stay under 48 MiB
    return 8 * 1024 * 1024, 64 * 1024 * 1024       # v5e / v6e: bigger tiles


def _choose_tiles(B, L, C, itemsize, budget_bytes):
    # Channel tile: lane-dense (multiple of 128) when C allows, else whole C.
    if C % 128 == 0:
        ct = 128 * _largest_divisor_leq(C // 128, 4)   # up to 512 lanes per step
    else:
        ct = C
    # Batch tile: dtype-aware per-step input budget; cap the unrolled per-row
    # MXU loop at 32 iterations.
    per_b = max(1, L * ct * itemsize)
    bt = _largest_divisor_leq(B, min(max(1, budget_bytes // per_b), 32))
    # Keep >= 2 parallel grid steps (v7x has 2 TensorCores, v5e/v6e megacore).
    if (B // bt) * (C // ct) < 2:
        if B > 1:
            bt = _largest_divisor_leq(B, max(1, bt // 2))
        elif C % 128 == 0 and ct > 128:
            ct = 128
    return bt, ct


def moving_avg(x, kernel_size, stride):
    """x: (B, L, C) -> (B, L_out, C), matching torch moving_avg.forward."""
    B, L, C = x.shape
    pad = (kernel_size - 1) // 2
    L_pad = L + 2 * pad
    L_out = (L_pad - kernel_size) // stride + 1
    if L_out < 1:
        raise ValueError("kernel_size too large for this sequence length")

    dtype = jnp.dtype(x.dtype)
    # Exact integer multiplicities; 1/K is applied in f32 inside the kernel.
    w = jnp.asarray(_build_weight(L, kernel_size, stride, pad, L_out), dtype=dtype)

    budget, vmem_limit = _vmem_budget()
    bt, ct = _choose_tiles(B, L, C, dtype.itemsize, budget)

    precision = (jax.lax.Precision.HIGHEST
                 if dtype == jnp.dtype(jnp.float32)
                 else jax.lax.Precision.DEFAULT)
    kernel = functools.partial(_moving_avg_kernel,
                               inv_k=1.0 / kernel_size,
                               precision=precision)

    return pl.pallas_call(
        kernel,
        out_shape=jax.ShapeDtypeStruct((B, L_out, C), dtype),
        grid_spec=pltpu.PrefetchScalarGridSpec(
            num_scalar_prefetch=0,
            grid=(B // bt, C // ct),
            in_specs=[
                pl.BlockSpec((L_out, L), lambda i, j: (0, 0)),      # W: fetched once
                pl.BlockSpec((bt, L, ct), lambda i, j: (i, 0, j)),  # x block
            ],
            out_specs=pl.BlockSpec((bt, L_out, ct), lambda i, j: (i, 0, j)),
        ),
        compiler_params=pltpu.CompilerParams(
            dimension_semantics=("parallel", "parallel"),
            vmem_limit_bytes=vmem_limit,
        ),
    )(w, x)


def _reference(x, kernel_size, stride):
    """Pure-JAX reference reproducing the torch module exactly."""
    pad = (kernel_size - 1) // 2
    front = jnp.repeat(x[:, 0:1, :], pad, axis=1)
    end = jnp.repeat(x[:, -1:, :], pad, axis=1)
    xp = jnp.concatenate([front, x, end], axis=1)
    L_pad = xp.shape[1]
    L_out = (L_pad - kernel_size) // stride + 1
    windows = jnp.stack(
        [xp[:, l * stride:l * stride + kernel_size, :] for l in range(L_out)],
        axis=1,
    )  # (B, L_out, K, C)
    return jnp.mean(windows, axis=2)


if __name__ == "__main__":
    key = jax.random.PRNGKey(0)
    k1, k2 = jax.random.split(key)

    # Autoformer-style configuration: kernel_size=25, stride=1.
    x1 = jax.random.normal(k1, (4, 64, 16), dtype=jnp.float32)
    out1 = jax.block_until_ready(moving_avg(x1, 25, 1))
    ref1 = _reference(x1, 25, 1)
    assert out1.shape == ref1.shape, (out1.shape, ref1.shape)
    assert float(jnp.max(jnp.abs(out1 - ref1))) < 1e-4

    # Even kernel + stride > 1 + lane-dense (C=128) channel tile.
    x2 = jax.random.normal(k2, (2, 16, 128), dtype=jnp.float32)
    out2 = jax.block_until_ready(moving_avg(x2, 4, 2))
    ref2 = _reference(x2, 4, 2)
    assert out2.shape == ref2.shape, (out2.shape, ref2.shape)
    assert float(jnp.max(jnp.abs(out2 - ref2))) < 1e-4

    print("KERNEL_OK")
</pallas_src>

<mosaic_0001>
module attributes {stable_mosaic.version = 11 : i64} {
  func.func @_moving_avg_kernel(%arg0: i32, %arg1: i32, %arg2: memref<64x64xf32, #tpu.memory_space<vmem>>, %arg3: memref<2x64x16xf32, #tpu.memory_space<vmem>>, %arg4: memref<2x64x16xf32, #tpu.memory_space<vmem>>) attributes {dimension_semantics = [#tpu.dimension_semantics<parallel>, #tpu.dimension_semantics<parallel>], iteration_bounds = array<i64: 2, 1>, scalar_prefetch = 0 : i64, scratch_operands = 0 : i64, tpu.core_type = #tpu.core_type<tc>, window_params = [{pipeline_mode = #tpu.pipeline_mode<synchronous>, transform_indices = @transform_0, window_bounds = array<i64: 64, 64>}, {transform_indices = @transform_1, window_bounds = array<i64: 2, 64, 16>}, {transform_indices = @transform_2, window_bounds = array<i64: 2, 64, 16>}]} {
    %c0 = arith.constant 0 : index
    %c0_0 = arith.constant 0 : index
    %0 = vector.load %arg2[%c0, %c0_0] : memref<64x64xf32, #tpu.memory_space<vmem>>, vector<64x64xf32>
    %c0_1 = arith.constant 0 : index
    %c0_2 = arith.constant 0 : index
    %c0_3 = arith.constant 0 : index
    %1 = vector.load %arg3[%c0_1, %c0_2, %c0_3] : memref<2x64x16xf32, #tpu.memory_space<vmem>>, vector<1x64x16xf32>
    %2 = vector.shape_cast %1 : vector<1x64x16xf32> to vector<64x16xf32>
    %cst = arith.constant dense<0.000000e+00> : vector<64x16xf32>
    %3 = tpu.matmul %0, %2, %cst {dimension_numbers = #tpu.dot_dimension_numbers<[1], [0], [0], [1], [0, 0, 1, 1], [], []>, precision = #tpu.contract_precision<fp32>} : vector<64x64xf32>, vector<64x16xf32>, vector<64x16xf32> -> vector<64x16xf32>
    %cst_4 = arith.constant 4.000000e-02 : f32
    %4 = vector.broadcast %cst_4 : f32 to vector<64x16xf32>
    %5 = arith.mulf %3, %4 : vector<64x16xf32>
    %c0_5 = arith.constant 0 : index
    %c0_6 = arith.constant 0 : index
    %c0_7 = arith.constant 0 : index
    %6 = vector.load %arg4[%c0_5, %c0_6, %c0_7] : memref<2x64x16xf32, #tpu.memory_space<vmem>>, vector<1x64x16xf32>
    %7 = vector.shape_cast %6 : vector<1x64x16xf32> to vector<64x16xf32>
    %8 = vector.shape_cast %5 : vector<64x16xf32> to vector<1x64x16xf32>
    tpu.vector_store %arg4[%c0_5, %c0_6, %c0_7], %8 {strides = array<i32>} : memref<2x64x16xf32, #tpu.memory_space<vmem>>, vector<1x64x16xf32>,
    %c1 = arith.constant 1 : index
    %c0_8 = arith.constant 0 : index
    %c0_9 = arith.constant 0 : index
    %9 = vector.load %arg3[%c1, %c0_8, %c0_9] : memref<2x64x16xf32, #tpu.memory_space<vmem>>, vector<1x64x16xf32>
    %10 = vector.shape_cast %9 : vector<1x64x16xf32> to vector<64x16xf32>
    %cst_10 = arith.constant dense<0.000000e+00> : vector<64x16xf32>
    %11 = tpu.matmul %0, %10, %cst_10 {dimension_numbers = #tpu.dot_dimension_numbers<[1], [0], [0], [1], [0, 0, 1, 1], [], []>, precision = #tpu.contract_precision<fp32>} : vector<64x64xf32>, vector<64x16xf32>, vector<64x16xf32> -> vector<64x16xf32>
    %cst_11 = arith.constant 4.000000e-02 : f32
    %12 = vector.broadcast %cst_11 : f32 to vector<64x16xf32>
    %13 = arith.mulf %11, %12 : vector<64x16xf32>
    %c1_12 = arith.constant 1 : index
    %c0_13 = arith.constant 0 : index
    %c0_14 = arith.constant 0 : index
    %14 = vector.load %arg4[%c1_12, %c0_13, %c0_14] : memref<2x64x16xf32, #tpu.memory_space<vmem>>, vector<1x64x16xf32>
    %15 = vector.shape_cast %14 : vector<1x64x16xf32> to vector<64x16xf32>
    %16 = vector.shape_cast %13 : vector<64x16xf32> to vector<1x64x16xf32>
    tpu.vector_store %arg4[%c1_12, %c0_13, %c0_14], %16 {strides = array<i32>} : memref<2x64x16xf32, #tpu.memory_space<vmem>>, vector<1x64x16xf32>,
    return
  }
  func.func @transform_0(%arg0: i32, %arg1: i32) -> (i32, i32) {
    %c0_i32 = arith.constant 0 : i32
    %c0_i32_0 = arith.constant 0 : i32
    %c0_i32_1 = arith.constant 0 : i32
    return %c0_i32, %c0_i32_0 : i32, i32
  }
  func.func @transform_1(%arg0: i32, %arg1: i32) -> (i32, i32, i32) {
    %c0_i32 = arith.constant 0 : i32
    %c0_i32_0 = arith.constant 0 : i32
    return %arg0, %c0_i32, %arg1 : i32, i32, i32
  }
  func.func @transform_2(%arg0: i32, %arg1: i32) -> (i32, i32, i32) {
    %c0_i32 = arith.constant 0 : i32
    %c0_i32_0 = arith.constant 0 : i32
    return %arg0, %c0_i32, %arg1 : i32, i32, i32
  }
}

</mosaic_0001>

<bundles_post_ra>
// kernel: tpu_custom_call.1
= control target key start
LH: loop header
LB: loop body
LE: loop exit
PB: predicated region body
PF: predicated region fallthrough
CT: control target
= control target key end

     0   :  { %s1356_s9 = smov 0   ;;  %s1358_s10 = smov 0   ;;  %s2011_s0 = inlined_call_operand.vmem [shape: f32[64,64], index: 0, kind: input, shape index: {}]   ;;  %s2012_s1 = inlined_call_operand.vmem [shape: f32[4,64,16], index: 1, kind: input, shape index: {}]   ;;  %s2013_s2 = inlined_call_operand.vmem [shape: f32[4,64,16], index: 2, kind: output, shape index: {}]  }
   0x1   :  { %s1360_s11 = smov 0  }
   0x2 LB: > { %s24_s12 = sadd.s32 1, %s1335_s10  ;;  %p1266_p0 = scmp.ge.s32.totalorder %s1339_s11, 1  ;;  %s1339_s11 = sphi %s1360_s11, %s12_s11   ;;  %s1335_s10 = sphi %s1358_s10, %s2015_s10   ;;  %s1331_s9 = sphi %s1356_s9, %s2014_s9  }
   0x3   : > { %p26_p1 = scmp.ge.s32.totalorder %s24_s12, 2  ;;  %p133_p2 = scmp.lt.s32.totalorder %s1339_s11, 3 }
   0x5   : > { %s2017_s12 = smov (%p26_p1, %s24_s12), 0  ;;  %p134_p3 = pnand %p1266_p0, %p133_p2 }
   0x6   : > { %s1267_s13 = sshll.u32 (!%p134_p3), %s1331_s9, 1 }
   0x7   : > { %137 = sbr.rel (%p134_p3) target bundleno = 360 (0x168), region = 28  ;;  %p164_p4 = scmp.lt.s32.totalorder (!%p134_p3), %s1267_s13, 3 }
   0xc   : > { %v183_v0 = vld [vmem:[%s2011_s0] sm:$0xff]  ;;  %vm199_vm0 = vcmask 523264   ;;  %s2019_s13 = smov (!%p164_p4, %s1267_s13), 3  ;;  %v184_v2 = vld [vmem:[%s2011_s0 + $0x8] sm:$0xff]  ;;  %v185_v33 = vld [vmem:[%s2011_s0 + $0x10] sm:$0xff]  ;;  %vm686_vm1 = vcmask 130048  }
   0xd   : > { %v201_v1 = vsel %vm199_vm0, %v183_v0, 0  ;;  %s1291_s18 = sshll.u32 %s2019_s13, 6  ;;  %v204_v7 = vsel %vm199_vm0, %v184_v2, 0  ;;  %v207_v44 = vsel %vm199_vm0, %v185_v33, 0 }
   0xe   : > { %v1384_v3 = vand.u32 4294901760, %v201_v1  ;;  %s1391_s21 = scalar_lea.vmem %s2012_s1, %s1291_s18  ;;  %v1440_v28 = vand.u32 4294901760, %v204_v7  ;;  %v1506_v58 = vand.u32 4294901760, %v207_v44  ;;  %s1901_s8 = scalar_lea.vmem %s2013_s2, %s1291_s18 }
   0xf   : > { %v198_v4 = vld [vmem:[%s1391_s21 + $0x38] sm:$0xff]  ;;  %v197_v5 = vld [vmem:[%s1391_s21 + $0x30] sm:$0xff]  ;;  %v196_v6 = vld [vmem:[%s1391_s21 + $0x28] sm:$0xff] }
  0x10   : > { %v1397_v8 = vand.u32 4294901760, %v198_v4  ;;  %v1399_v9 = vand.u32 4294901760, %v197_v5  ;;  %v1401_v10 = vand.u32 4294901760, %v196_v6  ;;  %v195_v11 = vld [vmem:[%s1391_s21 + $0x20] sm:$0xff]  ;;  %v194_v12 = vld [vmem:[%s1391_s21 + $0x18] sm:$0xff]  ;;  %v193_v13 = vld [vmem:[%s1391_s21 + $0x10] sm:$0xff]  ;;  %v1415_v19 = vsub.f32 %v201_v1, %v1384_v3 }
  0x11   : > { %v1406_v14 = vand.u32 4294901760, %v195_v11  ;;  %v1408_v15 = vand.u32 4294901760, %v194_v12  ;;  %v1410_v16 = vand.u32 4294901760, %v193_v13  ;;  %v192_v17 = vld [vmem:[%s1391_s21 + $0x8] sm:$0xff]  ;;  %v191_v18 = vld [vmem:[%s1391_s21] sm:$0xff]  ;;  %v1280_v27 = vld [vmem:[%s1391_s21 + $0x78] sm:$0xff]  ;;  %v1497_v53 = vsub.f32 %v204_v7, %v1440_v28 }
  0x12   : > { %233 = vmatpush.msra.mxu0 %v1397_v8  ;;  %v1419_v20 = vsub.f32 %v198_v4, %v1397_v8  ;;  %484 = vmatpush.msra.mxu3 %v1397_v8  ;;  %v1423_v21 = vsub.f32 %v197_v5, %v1399_v9  ;;  %v1426_v22 = vsub.f32 %v196_v6, %v1401_v10  ;;  %v1428_v23 = vand.u32 4294901760, %v192_v17  ;;  %v1279_v43 = vld [vmem:[%s1391_s21 + $0x70] sm:$0xff]  ;;  %v1278_v49 = vld [vmem:[%s1391_s21 + $0x68] sm:$0xff]  ;;  %v1277_v0 = vld [vmem:[%s1391_s21 + $0x60] sm:$0xff] }
  0x13   : > { %v1431_v24 = vsub.f32 %v195_v11, %v1406_v14  ;;  %v1434_v25 = vsub.f32 %v194_v12, %v1408_v15  ;;  %v1437_v26 = vsub.f32 %v193_v13, %v1410_v16  ;;  %v1447_v32 = vand.u32 4294901760, %v191_v18 }
  0x14   : > { %235 = vmatpush.msra.mxu0 %v1399_v9  ;;  %412 = vmatpush.msra.mxu2 %v1419_v20  ;;  %v323_v29 = vand.u32 4294901760, %v1419_v20  ;;  %v329_v30 = vand.u32 4294901760, %v1423_v21  ;;  %v335_v31 = vand.u32 4294901760, %v1426_v22  ;;  %v1455_v35 = vand.u32 4294901760, %v1415_v19 }
  0x15   : > { %486 = vmatpush.msra.mxu3 %v1399_v9  ;;  %v341_v34 = vand.u32 4294901760, %v1431_v24  ;;  %v347_v36 = vand.u32 4294901760, %v1434_v25  ;;  %v1459_v37 = vsub.f32 %v192_v17, %v1428_v23  ;;  %v1472_v41 = vand.u32 4294901760, %v1280_v27  ;;  %v186_v17 = vld [vmem:[%s2011_s0 + $0x18] sm:$0xff] }
  0x16   : > { %237 = vmatpush.msra.mxu0 %v1401_v10  ;;  %415 = vmatpush.msra.mxu2 %v1423_v21  ;;  %v324_v38 = vsub.f32 %v1419_v20, %v323_v29  ;;  %v330_v39 = vsub.f32 %v1423_v21, %v329_v30  ;;  %v336_v40 = vsub.f32 %v1426_v22, %v335_v31  ;;  %v353_v42 = vand.u32 4294901760, %v1437_v26 }
  0x17   : > { %488 = vmatpush.msra.mxu3 %v1401_v10  ;;  %v342_v47 = vsub.f32 %v1431_v24, %v341_v34  ;;  %v1484_v48 = vsub.f32 %v191_v18, %v1447_v32  ;;  %v251_v50 = vsub.f32 %v1415_v19, %v1455_v35  ;;  %v348_v51 = vsub.f32 %v1434_v25, %v347_v36 }
  0x18   : > { %239 = vmatpush.msra.mxu0 %v1406_v14  ;;  %v325_v45 = vand.u32 4294901760, %v324_v38  ;;  %418 = vmatpush.msra.mxu2 %v1426_v22  ;;  %v331_v46 = vand.u32 4294901760, %v330_v39  ;;  %v1494_v52 = vsub.f32 %v1280_v27, %v1472_v41  ;;  %v337_v54 = vand.u32 4294901760, %v336_v40 }
  0x19   : > { %490 = vmatpush.msra.mxu3 %v1406_v14  ;;  %v359_v55 = vand.u32 4294901760, %v1459_v37  ;;  %v1501_v56 = vand.u32 4294901760, %v1279_v43  ;;  %v1508_v59 = vand.u32 4294901760, %v1278_v49  ;;  %v343_v60 = vand.u32 4294901760, %v342_v47 }
  0x1a   : > { %241 = vmatpush.msra.mxu0 %v1408_v15  ;;  %326 = vmatpush.msra.mxu1 %v325_v45  ;;  %v803_v57 = vand.u32 4294901760, %v1494_v52  ;;  %v354_v61 = vsub.f32 %v1437_v26, %v353_v42  ;;  %v365_v62 = vand.u32 4294901760, %v1484_v48  ;;  %v1521_v1 = vand.u32 4294901760, %v251_v50 }
  0x1b   : > { %421 = vmatpush.msra.mxu2 %v1431_v24  ;;  %492 = vmatpush.msra.mxu3 %v1408_v15  ;;  %v1516_v63 = vsub.f32 %v1279_v43, %v1501_v56  ;;  %v349_v2 = vand.u32 4294901760, %v348_v51  ;;  %v1524_v4 = vand.u32 4294901760, %v1497_v53  ;;  %v1527_v5 = vsub.f32 %v1278_v49, %v1508_v59  ;;  %v1276_v51 = vld [vmem:[%s1391_s21 + $0x58] sm:$0xff] }
  0x1c   : > { %243 = vmatpush.msra.mxu0 %v1410_v16  ;;  %332 = vmatpush.msra.mxu1 %v331_v46  ;;  %v360_v6 = vsub.f32 %v1459_v37, %v359_v55  ;;  %v804_v7 = vsub.f32 %v1494_v52, %v803_v57  ;;  %v1537_v12 = vand.u32 4294901760, %v1277_v0  ;;  %v1542_v13 = vsub.f32 %v207_v44, %v1506_v58 }
  0x1d   : > { %424 = vmatpush.msra.mxu2 %v1434_v25  ;;  %494 = vmatpush.msra.mxu3 %v1410_v16  ;;  %v809_v11 = vand.u32 4294901760, %v1516_v63  ;;  %v355_v18 = vand.u32 4294901760, %v354_v61  ;;  %v366_v27 = vsub.f32 %v1484_v48, %v365_v62  ;;  %v259_v39 = vsub.f32 %v1497_v53, %v1524_v4 }
  0x1e   : > { %245 = vmatpush.msra.mxu0 %v1428_v23  ;;  %338 = vmatpush.msra.mxu1 %v337_v54  ;;  %v1555_v38 = vsub.f32 %v1277_v0, %v1537_v12  ;;  %v815_v40 = vand.u32 4294901760, %v1527_v5  ;;  %v361_v43 = vand.u32 4294901760, %v360_v6  ;;  %v805_v44 = vand.u32 4294901760, %v804_v7 }
  0x1f   : > { %427 = vmatpush.msra.mxu2 %v1437_v26  ;;  %496 = vmatpush.msra.mxu3 %v1428_v23  ;;  %v810_v33 = vsub.f32 %v1516_v63, %v809_v11  ;;  %v210_v45 = vsel %vm199_vm0, %v186_v17, 0  ;;  %v367_v47 = vand.u32 4294901760, %v366_v27  ;;  %v1569_v50 = vand.u32 4294901760, %v1542_v13  ;;  %v189_v26 = vld [vmem:[%s2011_s0 + $0x30] sm:$0xff] }
  0x20   : > { %247 = vmatpush.msra.mxu0 %v1447_v32  ;;  %344 = vmatpush.msra.mxu1 %v343_v60  ;;  %v821_v46 = vand.u32 4294901760, %v1555_v38  ;;  %v1575_v54 = vand.u32 4294901760, %v259_v39  ;;  %v816_v60 = vsub.f32 %v1527_v5, %v815_v40  ;;  %v1580_v61 = vand.u32 4294901760, %v210_v45 }
  0x21   : > { %253 = vmatmul.f32.vlgmr.msra.gmra.mxu0 %v1521_v1  ;;  %430 = vmatpush.msra.mxu2 %v1459_v37  ;;  %v811_v49 = vand.u32 4294901760, %v810_v33  ;;  %v1582_v0 = vand.u32 4294901760, %v1276_v51  ;;  %v267_v21 = vsub.f32 %v1542_v13, %v1569_v50  ;;  %v1275_v33 = vld [vmem:[%s1391_s21 + $0x50] sm:$0xff] }
  0x22   : > { %350 = vmatpush.msra.mxu1 %v349_v2  ;;  %498 = vmatpush.msra.mxu3 %v1447_v32  ;;  %v822_v20 = vsub.f32 %v1555_v38, %v821_v46  ;;  %v1601_v6 = vsub.f32 %v210_v45, %v1580_v61 }
  0x23   : > { %433 = vmatpush.msra.mxu2 %v1484_v48  ;;  %502 = vmatmul.f32.vlgmr.msra.gmra.mxu3 %v1455_v35  ;;  %v1594_v2 = vsub.f32 %v1276_v51, %v1582_v0 }
  0x24   : > { %356 = vmatpush.msra.mxu1 %v355_v18  ;;  %436 = vmatmul.f32.vlgmr.msra.gmra.mxu2 %v1415_v19  ;;  %v823_v18 = vand.u32 4294901760, %v822_v20  ;;  %v1619_v39 = vand.u32 4294901760, %v1601_v6  ;;  %v219_v20 = vsel %vm199_vm0, %v189_v26, 0 }
  0x25   : > { %713 = vmatpush.msrb.mxu2 %v1472_v41  ;;  %559 = vmatpush.msrb.mxu0 %v323_v29  ;;  %v187_v29 = vld [vmem:[%s2011_s0 + $0x20] sm:$0xff]  ;;  %v827_v7 = vand.u32 4294901760, %v1594_v2 }
  0x26   : > { %362 = vmatpush.msra.mxu1 %v361_v43  ;;  %806 = vmatpush.msrb.mxu3 %v805_v44  ;;  %v213_v17 = vsel %vm199_vm0, %v187_v29, 0 }
  0x27   : > { %715 = vmatpush.msrb.mxu2 %v1501_v56  ;;  %563 = vmatpush.msrb.mxu0 %v329_v30  ;;  %v817_v30 = vand.u32 4294901760, %v816_v60  ;;  %v828_v27 = vsub.f32 %v1594_v2, %v827_v7  ;;  %v1622_v22 = vand.u32 4294901760, %v213_v17  ;;  %v1273_v60 = vld [vmem:[%s1391_s21 + $0x40] sm:$0xff] }
  0x28   : > { %368 = vmatpush.msra.mxu1 %v367_v47  ;;  %812 = vmatpush.msrb.mxu3 %v811_v49  ;;  %v1690_v29 = vand.u32 4294901760, %v1273_v60 }
  0x29   : > { %261 = vmatmul.f32.gmra.mxu0 %v1575_v54  ;;  %370 = vmatmul.f32.vlgmr.msra.gmra.mxu1 %v1384_v3  ;;  %v829_v43 = vand.u32 4294901760, %v828_v27  ;;  %v1644_v24 = vsub.f32 %v213_v17, %v1622_v22 }
  0x2a   : > { %630 = vmatpush.msrb.mxu1 %v1397_v8  ;;  %717 = vmatpush.msrb.mxu2 %v1508_v59  ;;  %v1616_v8 = vand.u32 4294901760, %v267_v21  ;;  %v844_v48 = vsub.f32 %v1273_v60, %v1690_v29 }
  0x2b   : > { %508 = vmatmul.f32.gmra.mxu3 %v1524_v4  ;;  %567 = vmatpush.msrb.mxu0 %v335_v31  ;;  %v1624_v31 = vand.u32 4294901760, %v1275_v33 }
  0x2c   : > { %441 = vmatmul.f32.gmra.mxu2 %v1497_v53  ;;  %632 = vmatpush.msrb.mxu1 %v1399_v9  ;;  %v188_v9 = vld [vmem:[%s2011_s0 + $0x28] sm:$0xff]  ;;  %v845_v17 = vand.u32 4294901760, %v844_v48 }
  0x2d   : > { %818 = vmatpush.msrb.mxu3 %v817_v30  ;;  %719 = vmatpush.msrb.mxu2 %v1537_v12  ;;  %v1634_v44 = vsub.f32 %v1275_v33, %v1624_v31 }
  0x2e   : > { %634 = vmatpush.msrb.mxu1 %v1401_v10  ;;  %571 = vmatpush.msrb.mxu0 %v341_v34  ;;  %v275_v10 = vsub.f32 %v1601_v6, %v1619_v39  ;;  %v216_v34 = vsel %vm199_vm0, %v188_v9, 0  ;;  %v846_v27 = vsub.f32 %v844_v48, %v845_v17 }
  0x2f   : > { %824 = vmatpush.msrb.mxu3 %v823_v18  ;;  %721 = vmatpush.msrb.mxu2 %v1582_v0  ;;  %v833_v45 = vand.u32 4294901760, %v1634_v44  ;;  %v1655_v25 = vand.u32 4294901760, %v216_v34  ;;  %v190_v18 = vld [vmem:[%s2011_s0 + $0x38] sm:$0xff] }
  0x30   : > { %636 = vmatpush.msrb.mxu1 %v1406_v14  ;;  %575 = vmatpush.msrb.mxu0 %v347_v36  ;;  %v1274_v36 = vld [vmem:[%s1391_s21 + $0x48] sm:$0xff]  ;;  %v1660_v47 = vand.u32 4294901760, %v275_v10  ;;  %v222_v33 = vsel %vm199_vm0, %v190_v18, 0 }
  0x31   : > { %269 = vmatmul.f32.gmra.mxu0 %v1616_v8  ;;  %374 = vmatmul.f32.gmra.mxu1 %v1440_v28  ;;  %v834_v14 = vsub.f32 %v1634_v44, %v833_v45  ;;  %v1666_v51 = vand.u32 4294901760, %v1274_v36  ;;  %v1685_v37 = vsub.f32 %v216_v34, %v1655_v25  ;;  %v1738_v9 = vand.u32 4294901760, %v222_v33 }
  0x32   : > { %830 = vmatpush.msrb.mxu3 %v829_v43  ;;  %638 = vmatpush.msrb.mxu1 %v1408_v15  ;;  %v1663_v15 = vand.u32 4294901760, %v1644_v24  ;;  %v847_v43 = vand.u32 4294901760, %v846_v27 }
  0x33   : > { %514 = vmatmul.f32.gmra.mxu3 %v1569_v50  ;;  %723 = vmatpush.msrb.mxu2 %v1624_v31  ;;  %v835_v49 = vand.u32 4294901760, %v834_v14  ;;  %v1703_v21 = vand.u32 4294901760, %v1685_v37 }
  0x34   : > { %446 = vmatmul.f32.gmra.mxu2 %v1542_v13  ;;  %579 = vmatpush.msrb.mxu0 %v353_v42  ;;  %v1675_v42 = vsub.f32 %v1274_v36, %v1666_v51 }
  0x35   : > { %640 = vmatpush.msrb.mxu1 %v1410_v16  ;;  %836 = vmatpush.msrb.mxu3 %v835_v49  ;;  %v283_v16 = vsub.f32 %v1644_v24, %v1663_v15 }
  0x36   : > { %583 = vmatpush.msrb.mxu0 %v359_v55  ;;  %725 = vmatpush.msrb.mxu2 %v1666_v51  ;;  %v839_v55 = vand.u32 4294901760, %v1675_v42 }
  0x37   : > { %642 = vmatpush.msrb.mxu1 %v1428_v23 }
  0x38   : > { %587 = vmatpush.msrb.mxu0 %v365_v62  ;;  %v840_v23 = vsub.f32 %v1675_v42, %v839_v55  ;;  %v1700_v62 = vand.u32 4294901760, %v283_v16  ;;  %727 = vmatpush.msrb.mxu2 %v1690_v29 }
  0x39   : > { %277 = vmatmul.f32.gmra.mxu0 %v1660_v47  ;;  %378 = vmatmul.f32.gmra.mxu1 %v1506_v58 }
  0x3a   : > { %644 = vmatpush.msrb.mxu1 %v1447_v32  ;;  %892 = vmatpush.msra.mxu0 %v1494_v52  ;;  %v1705_v32 = vand.u32 4294901760, %v219_v20  ;;  %v841_v30 = vand.u32 4294901760, %v840_v23  ;;  %v291_v52 = vsub.f32 %v1685_v37, %v1703_v21 }
  0x3b   : > { %520 = vmatmul.f32.gmra.mxu3 %v1619_v39  ;;  %1039 = vmatpush.msra.mxu2 %v803_v57 }
  0x3c   : > { %964 = vmatpush.msra.mxu1 %v1472_v41  ;;  %451 = vmatmul.f32.gmra.mxu2 %v1601_v6  ;;  %v1724_v57 = vsub.f32 %v219_v20, %v1705_v32 }
  0x3d   : > { %895 = vmatpush.msra.mxu0 %v1516_v63  ;;  %842 = vmatpush.msrb.mxu3 %v841_v30  ;;  %v1733_v63 = vand.u32 4294901760, %v291_v52 }
  0x3e   : > { %966 = vmatpush.msra.mxu1 %v1501_v56  ;;  %1043 = vmatpush.msra.mxu2 %v809_v11  ;;  %v1736_v11 = vand.u32 4294901760, %v1724_v57 }
  0x3f   : > { %898 = vmatpush.msra.mxu0 %v1527_v5  ;;  %848 = vmatpush.msrb.mxu3 %v847_v43  ;;  %v1755_v5 = vsub.f32 %v222_v33, %v1738_v9 }
  0x40   : > { %968 = vmatpush.msra.mxu1 %v1508_v59  ;;  %1047 = vmatpush.msra.mxu2 %v815_v40 }
  0x41   : > { %901 = vmatpush.msra.mxu0 %v1555_v38  ;;  %382 = vmatmul.f32.gmra.mxu1 %v1580_v61  ;;  %v1765_v38 = vand.u32 4294901760, %v1755_v5 }
  0x42   : > { %285 = vmatmul.f32.gmra.mxu0 %v1700_v62  ;;  %970 = vmatpush.msra.mxu1 %v1537_v12 }
  0x43   : > { %526 = vmatmul.f32.gmra.mxu3 %v1663_v15  ;;  %904 = vmatpush.msra.mxu0 %v1594_v2 }
  0x44   : > { %456 = vmatmul.f32.gmra.mxu2 %v1644_v24  ;;  %1110 = vmatpush.msra.mxu3 %v1472_v41  ;;  %v299_v41 = vsub.f32 %v1724_v57, %v1736_v11 }
  0x45   : > { %1051 = vmatpush.msra.mxu2 %v821_v46  ;;  %972 = vmatpush.msra.mxu1 %v1582_v0 }
  0x46   : > { %907 = vmatpush.msra.mxu0 %v1634_v44  ;;  %1112 = vmatpush.msra.mxu3 %v1501_v56  ;;  %v300_v56 = vand.u32 4294901760, %v299_v41 }
  0x47   : > { %1055 = vmatpush.msra.mxu2 %v827_v7  ;;  %974 = vmatpush.msra.mxu1 %v1624_v31 }
  0x48   : > { %910 = vmatpush.msra.mxu0 %v1675_v42  ;;  %1114 = vmatpush.msra.mxu3 %v1508_v59  ;;  %v307_v59 = vsub.f32 %v1755_v5, %v1765_v38 }
  0x49   : > { %386 = vmatmul.f32.gmra.mxu1 %v1622_v22  ;;  %1059 = vmatpush.msra.mxu2 %v833_v45 }
  0x4a   : > { %293 = vmatmul.f32.gmra.mxu0 %v1733_v63  ;;  %976 = vmatpush.msra.mxu1 %v1666_v51 }
  0x4b   : > { %532 = vmatmul.f32.gmra.mxu3 %v1703_v21  ;;  %1063 = vmatpush.msra.mxu2 %v839_v55 }
  0x4c   : > { %461 = vmatmul.f32.gmra.mxu2 %v1685_v37  ;;  %1116 = vmatpush.msra.mxu3 %v1537_v12  ;;  %v308_v12 = vand.u32 4294901760, %v307_v59 }
  0x4d   : > { %913 = vmatpush.msra.mxu0 %v844_v48  ;;  %978 = vmatpush.msra.mxu1 %v1690_v29 }
  0x4e   : > { %1118 = vmatpush.msra.mxu3 %v1582_v0  ;;  %1067 = vmatpush.msra.mxu2 %v845_v17 }
  0x50   : > { %1120 = vmatpush.msra.mxu3 %v1624_v31 }
  0x51   : > { %390 = vmatmul.f32.gmra.mxu1 %v1655_v25 }
  0x52   : > { %301 = vmatmul.f32.gmra.mxu0 %v300_v56  ;;  %1122 = vmatpush.msra.mxu3 %v1666_v51 }
  0x53   : > { %538 = vmatmul.f32.gmra.mxu3 %v1736_v11 }
  0x54   : > { %466 = vmatmul.f32.gmra.mxu2 %v1724_v57  ;;  %1124 = vmatpush.msra.mxu3 %v1690_v29 }
  0x59   : > { %394 = vmatmul.f32.gmra.mxu1 %v1705_v32 }
  0x5a   : > { %309 = vmatmul.f32.gmra.mxu0 %v308_v12 }
  0x5b   : > { %544 = vmatmul.f32.gmra.mxu3 %v1765_v38 }
  0x5c   : > { %471 = vmatmul.f32.gmra.mxu2 %v1755_v5 }
  0x61   : > { %398 = vmatmul.f32.gmra.mxu1 %v1738_v9 }
  0x62   : > { %589 = vmatmul.f32.vlgmr.msrb.gmra.mxu0 %v1384_v3 }
  0x63   : > { %850 = vmatmul.f32.vlgmr.msrb.gmra.mxu3 %v1384_v3 }
  0x64   : > { %733 = vmatmul.f32.vlgmr.msrb.gmra.mxu2 %v1521_v1 }
  0x69   : > { %646 = vmatmul.f32.vlgmr.msrb.gmra.mxu1 %v1384_v3 }
  0x6a   : > { %593 = vmatmul.f32.gmra.mxu0 %v1440_v28 }
  0x6b   : > { %854 = vmatmul.f32.gmra.mxu3 %v1440_v28 }
  0x6c   : > { %741 = vmatmul.f32.gmra.mxu2 %v1575_v54 }
  0x71   : > { %650 = vmatmul.f32.gmra.mxu1 %v1440_v28 }
  0x72   : > { %597 = vmatmul.f32.gmra.mxu0 %v1506_v58 }
  0x73   : > { %858 = vmatmul.f32.gmra.mxu3 %v1506_v58 }
  0x74   : > { %749 = vmatmul.f32.gmra.mxu2 %v1616_v8 }
  0x79   : > { %654 = vmatmul.f32.gmra.mxu1 %v1506_v58 }
  0x7a   : > { %601 = vmatmul.f32.gmra.mxu0 %v1580_v61 }
  0x7b   : > { %862 = vmatmul.f32.gmra.mxu3 %v1580_v61 }
  0x7c   : > { %757 = vmatmul.f32.gmra.mxu2 %v1660_v47 }
  0x81   : > { %658 = vmatmul.f32.gmra.mxu1 %v1580_v61 }
  0x82   : > { %605 = vmatmul.f32.gmra.mxu0 %v1622_v22 }
  0x83   : > { %866 = vmatmul.f32.gmra.mxu3 %v1622_v22 }
  0x84   : > { %765 = vmatmul.f32.gmra.mxu2 %v1700_v62 }
  0x89   : > { %662 = vmatmul.f32.gmra.mxu1 %v1622_v22 }
  0x8a   : > { %609 = vmatmul.f32.gmra.mxu0 %v1655_v25 }
  0x8b   : > { %870 = vmatmul.f32.gmra.mxu3 %v1655_v25 }
  0x8c   : > { %773 = vmatmul.f32.gmra.mxu2 %v1733_v63 }
  0x91   : > { %666 = vmatmul.f32.gmra.mxu1 %v1655_v25 }
  0x92   : > { %613 = vmatmul.f32.gmra.mxu0 %v1705_v32 }
  0x93   : > { %874 = vmatmul.f32.gmra.mxu3 %v1705_v32 }
  0x94   : > { %781 = vmatmul.f32.gmra.mxu2 %v300_v56 }
  0x99   : > { %670 = vmatmul.f32.gmra.mxu1 %v1705_v32 }
  0x9a   : > { %617 = vmatmul.f32.gmra.mxu0 %v1738_v9 }
  0x9b   : > { %878 = vmatmul.f32.gmra.mxu3 %v1738_v9 }
  0x9c   : > { %789 = vmatmul.f32.gmra.mxu2 %v308_v12 }
  0x9e   : > { %v254_v1 = vpop.f32.mrf.mxu0 }
  0xa1   : > { %674 = vmatmul.f32.gmra.mxu1 %v1738_v9 }
  0xa2   : > { %916 = vmatmul.f32.vlgmr.msra.gmra.mxu0 %v1415_v19 }
  0xa3   : > { %1126 = vmatmul.f32.vlgmr.msra.gmra.mxu3 %v1384_v3 }
  0xa4   : > { %1069 = vmatmul.f32.vlgmr.msra.gmra.mxu2 %v1384_v3 }
  0xa6   : > { %v1814_v40 = vpop.f32.mrf.mxu0  ;;  %v371_v46 = vpop.f32.mrf.mxu1 }
  0xa7   : > { %v437_v54 = vpop.f32.mrf.mxu2  ;;  %v503_v0 = vpop.f32.mrf.mxu3  ;;  %v372_v36 = vadd.f32 %v371_v46, %v254_v1 }
  0xa9   : > { %982 = vmatmul.f32.vlgmr.msra.gmra.mxu1 %v1455_v35  ;;  %v438_v49 = vadd.f32 %v437_v54, %v372_v36 }
  0xaa   : > { %921 = vmatmul.f32.gmra.mxu0 %v1497_v53 }
  0xab   : > { %1130 = vmatmul.f32.gmra.mxu3 %v1440_v28  ;;  %v504_v42 = vadd.f32 %v503_v0, %v438_v49 }
  0xac   : > { %1073 = vmatmul.f32.gmra.mxu2 %v1440_v28 }
  0xae   : > { %v1820_v2 = vpop.f32.mrf.mxu0  ;;  %v375_v19 = vpop.f32.mrf.mxu1 }
  0xaf   : > { %v442_v7 = vpop.f32.mrf.mxu2  ;;  %v1822_v8 = vpop.f32.mrf.mxu3  ;;  %v376_v16 = vadd.f32 %v375_v19, %v1814_v40 }
  0xb1   : > { %988 = vmatmul.f32.gmra.mxu1 %v1524_v4  ;;  %v443_v20 = vadd.f32 %v442_v7, %v376_v16 }
  0xb2   : > { %926 = vmatmul.f32.gmra.mxu0 %v1542_v13 }
  0xb3   : > { %1134 = vmatmul.f32.gmra.mxu3 %v1506_v58 }
  0xb4   : > { %1077 = vmatmul.f32.gmra.mxu2 %v1506_v58 }
  0xb6   : > { %v1828_v3 = vpop.f32.mrf.mxu0  ;;  %v379_v35 = vpop.f32.mrf.mxu1 }
  0xb7   : > { %v1830_v53 = vpop.f32.mrf.mxu2  ;;  %v1832_v28 = vpop.f32.mrf.mxu3 }
  0xb9   : > { %994 = vmatmul.f32.gmra.mxu1 %v1569_v50 }
  0xba   : > { %931 = vmatmul.f32.gmra.mxu0 %v1601_v6 }
  0xbb   : > { %1138 = vmatmul.f32.gmra.mxu3 %v1580_v61 }
  0xbc   : > { %1081 = vmatmul.f32.gmra.mxu2 %v1580_v61 }
  0xbe   : > { %v383_v13 = vpop.f32.mrf.mxu1 }
  0xbf   : > { %v1838_v4 = vpop.f32.mrf.mxu0  ;;  %v1840_v31 = vpop.f32.mrf.mxu2 }
  0xc0   : > { %v1842_v58 = vpop.f32.mrf.mxu3 }
  0xc1   : > { %1000 = vmatmul.f32.gmra.mxu1 %v1619_v39 }
  0xc2   : > { %936 = vmatmul.f32.gmra.mxu0 %v1644_v24 }
  0xc3   : > { %1142 = vmatmul.f32.gmra.mxu3 %v1622_v22 }
  0xc4   : > { %1085 = vmatmul.f32.gmra.mxu2 %v1622_v22 }
  0xc6   : > { %v1850_v6 = vpop.f32.mrf.mxu1 }
  0xc7   : > { %v1848_v50 = vpop.f32.mrf.mxu0  ;;  %v1852_v61 = vpop.f32.mrf.mxu2  ;;  %v388_v46 = vadd.f32 %v1850_v6, %v1838_v4 }
  0xc8   : > { %v1854_v44 = vpop.f32.mrf.mxu3 }
  0xc9   : > { %1006 = vmatmul.f32.gmra.mxu1 %v1663_v15  ;;  %v458_v19 = vadd.f32 %v1852_v61, %v388_v46 }
  0xca   : > { %941 = vmatmul.f32.gmra.mxu0 %v1685_v37 }
  0xcb   : > { %1146 = vmatmul.f32.gmra.mxu3 %v1655_v25 }
  0xcc   : > { %1089 = vmatmul.f32.gmra.mxu2 %v1655_v25 }
  0xce   : > { %v1862_v10 = vpop.f32.mrf.mxu1 }
  0xcf   : > { %v1860_v39 = vpop.f32.mrf.mxu0  ;;  %v1864_v22 = vpop.f32.mrf.mxu2 }
  0xd0   : > { %v1866_v24 = vpop.f32.mrf.mxu3 }
  0xd1   : > { %1012 = vmatmul.f32.gmra.mxu1 %v1703_v21  ;;  %v510_v21 = vadd.f32 %v1822_v8, %v443_v20 }
  0xd2   : > { %946 = vmatmul.f32.gmra.mxu0 %v1724_v57 }
  0xd3   : > { %1150 = vmatmul.f32.gmra.mxu3 %v1705_v32 }
  0xd4   : > { %1093 = vmatmul.f32.gmra.mxu2 %v1705_v32  ;;  %v380_v32 = vadd.f32 %v379_v35, %v1820_v2 }
  0xd6   : > { %v1874_v45 = vpop.f32.mrf.mxu1  ;;  %v448_v27 = vadd.f32 %v1830_v53, %v380_v32  ;;  %v528_v53 = vadd.f32 %v1854_v44, %v458_v19 }
  0xd7   : > { %v1872_v34 = vpop.f32.mrf.mxu0  ;;  %v1876_v14 = vpop.f32.mrf.mxu2  ;;  %v396_v44 = vadd.f32 %v1874_v45, %v1860_v39 }
  0xd8   : > { %v1878_v25 = vpop.f32.mrf.mxu3  ;;  %v516_v63 = vadd.f32 %v1832_v28, %v448_v27  ;;  %v392_v28 = vadd.f32 %v1862_v10, %v1848_v50 }
  0xd9   : > { %1018 = vmatmul.f32.gmra.mxu1 %v1736_v11  ;;  %v384_v11 = vadd.f32 %v383_v13, %v1828_v3  ;;  %v468_v16 = vadd.f32 %v1876_v14, %v396_v44 }
  0xda   : > { %951 = vmatmul.f32.gmra.mxu0 %v1755_v5 }
  0xdb   : > { %1154 = vmatmul.f32.gmra.mxu3 %v1738_v9  ;;  %v453_v56 = vadd.f32 %v1840_v31, %v384_v11  ;;  %v540_v20 = vadd.f32 %v1878_v25, %v468_v16 }
  0xdc   : > { %1097 = vmatmul.f32.gmra.mxu2 %v1738_v9 }
  0xdd   : > { %v522_v40 = vadd.f32 %v1842_v58, %v453_v56  ;;  %v463_v58 = vadd.f32 %v1864_v22, %v392_v28 }
  0xde   : > { %v1884_v47 = vpop.f32.mrf.mxu1 }
  0xdf   : > { %v590_v15 = vpop.f32.mrf.mxu0  ;;  %v1886_v51 = vpop.f32.mrf.mxu2  ;;  %v534_v49 = vadd.f32 %v1866_v24, %v463_v58  ;;  %v400_v24 = vadd.f32 %v1884_v47, %v1872_v34 }
  0xe0   : > { %v1888_v26 = vpop.f32.mrf.mxu3  ;;  %v591_v37 = vadd.f32 %v590_v15, %v504_v42 }
  0xe1   : > { %1024 = vmatmul.f32.gmra.mxu1 %v1765_v38  ;;  %v473_v14 = vadd.f32 %v1886_v51, %v400_v24 }
  0xe6   : > { %v647_v60 = vpop.f32.mrf.mxu1 }
  0xe7   : > { %v594_v55 = vpop.f32.mrf.mxu0  ;;  %v648_v29 = vadd.f32 %v647_v60, %v591_v37  ;;  %v1892_v23 = vpop.f32.mrf.mxu2 }
  0xe8   : > { %v1894_v48 = vpop.f32.mrf.mxu3  ;;  %v595_v30 = vadd.f32 %v594_v55, %v510_v21 }
  0xe9   : > { %v678_v62 = vmul.f32 0.04, %v648_v29  ;;  %v852_v51 = vadd.f32 %v1894_v48, %v1892_v23 }
  0xeb   : > { %687 = vst.msk [vmem:[%s1901_s8] sm:$0xff] %vm686_vm1, %v678_v62 }
  0xee   : > { %v651_v18 = vpop.f32.mrf.mxu1 }
  0xef   : > { %v598_v17 = vpop.f32.mrf.mxu0  ;;  %v652_v52 = vadd.f32 %v651_v18, %v595_v30  ;;  %v1908_v57 = vpop.f32.mrf.mxu2 }
  0xf0   : > { %v1910_v33 = vpop.f32.mrf.mxu3  ;;  %v599_v9 = vadd.f32 %v598_v17, %v516_v63  ;;  %v546_v17 = vadd.f32 %v1888_v26, %v473_v14 }
  0xf1   : > { %v679_v43 = vmul.f32 0.04, %v652_v52 }
  0xf3   : > { %688 = vst.msk [vmem:[%s1901_s8 + $0x8] sm:$0xff] %vm686_vm1, %v679_v43 }
  0xf6   : > { %v655_v5 = vpop.f32.mrf.mxu1 }
  0xf7   : > { %v602_v41 = vpop.f32.mrf.mxu0  ;;  %v656_v38 = vadd.f32 %v655_v5, %v599_v9  ;;  %v1917_v59 = vpop.f32.mrf.mxu2 }
  0xf8   : > { %v1919_v12 = vpop.f32.mrf.mxu3  ;;  %v603_v54 = vadd.f32 %v602_v41, %v522_v40 }
  0xf9   : > { %v680_v1 = vmul.f32 0.04, %v656_v38  ;;  %v856_v38 = vadd.f32 %v1910_v33, %v1908_v57 }
  0xfb   : > { %689 = vst.msk [vmem:[%s1901_s8 + $0x10] sm:$0xff] %vm686_vm1, %v680_v1 }
  0xfe   : > { %v659_v2 = vpop.f32.mrf.mxu1 }
  0xff   : > { %v606_v0 = vpop.f32.mrf.mxu0  ;;  %v660_v7 = vadd.f32 %v659_v2, %v603_v54  ;;  %v1927_v8 = vpop.f32.mrf.mxu2 }
 0x100   : > { %v1929_v3 = vpop.f32.mrf.mxu3  ;;  %v607_v4 = vadd.f32 %v606_v0, %v528_v53 }
 0x101   : > { %v681_v35 = vmul.f32 0.04, %v660_v7  ;;  %v860_v7 = vadd.f32 %v1919_v12, %v1917_v59 }
 0x103   : > { %690 = vst.msk [vmem:[%s1901_s8 + $0x18] sm:$0xff] %vm686_vm1, %v681_v35 }
 0x106   : > { %v663_v31 = vpop.f32.mrf.mxu1 }
 0x107   : > { %v610_v13 = vpop.f32.mrf.mxu0  ;;  %v664_v6 = vadd.f32 %v663_v31, %v607_v4  ;;  %v1937_v61 = vpop.f32.mrf.mxu2 }
 0x108   : > { %v1939_v36 = vpop.f32.mrf.mxu3  ;;  %v611_v50 = vadd.f32 %v610_v13, %v534_v49 }
 0x109   : > { %v682_v15 = vmul.f32 0.04, %v664_v6  ;;  %v864_v6 = vadd.f32 %v1929_v3, %v1927_v8 }
 0x10b   : > { %691 = vst.msk [vmem:[%s1901_s8 + $0x20] sm:$0xff] %vm686_vm1, %v682_v15 }
 0x10e   : > { %v667_v42 = vpop.f32.mrf.mxu1 }
 0x10f   : > { %v614_v10 = vpop.f32.mrf.mxu0  ;;  %v668_v22 = vadd.f32 %v667_v42, %v611_v50  ;;  %v1947_v37 = vpop.f32.mrf.mxu2 }
 0x110   : > { %v1949_v55 = vpop.f32.mrf.mxu3  ;;  %v615_v39 = vadd.f32 %v614_v10, %v540_v20 }
 0x111   : > { %v683_v60 = vmul.f32 0.04, %v668_v22  ;;  %v868_v22 = vadd.f32 %v1939_v36, %v1937_v61 }
 0x113   : > { %692 = vst.msk [vmem:[%s1901_s8 + $0x28] sm:$0xff] %vm686_vm1, %v683_v60 }
 0x116   : > { %v671_v29 = vpop.f32.mrf.mxu1 }
 0x117   : > { %v618_v45 = vpop.f32.mrf.mxu0  ;;  %v672_v62 = vadd.f32 %v671_v29, %v615_v39  ;;  %v1957_v21 = vpop.f32.mrf.mxu2 }
 0x118   : > { %v1959_v32 = vpop.f32.mrf.mxu3  ;;  %v619_v25 = vadd.f32 %v618_v45, %v546_v17 }
 0x119   : > { %v684_v30 = vmul.f32 0.04, %v672_v62  ;;  %v872_v62 = vadd.f32 %v1949_v55, %v1947_v37 }
 0x11b   : > { %693 = vst.msk [vmem:[%s1901_s8 + $0x30] sm:$0xff] %vm686_vm1, %v684_v30 }
 0x11e   : > { %v675_v34 = vpop.f32.mrf.mxu1 }
 0x11f   : > { %v917_v47 = vpop.f32.mrf.mxu0  ;;  %v676_v18 = vadd.f32 %v675_v34, %v619_v25  ;;  %v1964_v27 = vpop.f32.mrf.mxu2 }
 0x120   : > { %v1966_v52 = vpop.f32.mrf.mxu3  ;;  %v918_v63 = vadd.f32 %v917_v47, %v852_v51  ;;  %v876_v51 = vadd.f32 %v1959_v32, %v1957_v21 }
 0x121   : > { %v685_v43 = vmul.f32 0.04, %v676_v18 }
 0x123   : > { %694 = vst.msk [vmem:[%s1901_s8 + $0x38] sm:$0xff] %vm686_vm1, %v685_v43 }
 0x126   : > { %v983_v26 = vpop.f32.mrf.mxu1 }
 0x127   : > { %v922_v11 = vpop.f32.mrf.mxu0  ;;  %v984_v9 = vadd.f32 %v983_v26, %v918_v63  ;;  %v1070_v41 = vpop.f32.mrf.mxu2 }
 0x128   : > { %v1127_v5 = vpop.f32.mrf.mxu3  ;;  %v923_v40 = vadd.f32 %v922_v11, %v856_v38  ;;  %v880_v38 = vadd.f32 %v1966_v52, %v1964_v27 }
 0x129   : > { %v1071_v56 = vadd.f32 %v1070_v41, %v984_v9 }
 0x12b   : > { %v1128_v1 = vadd.f32 %v1127_v5, %v1071_v56 }
 0x12d   : > { %v1158_v46 = vmul.f32 0.04, %v1128_v1 }
 0x12e   : > { %v989_v0 = vpop.f32.mrf.mxu1 }
 0x12f   : > { %v927_v54 = vpop.f32.mrf.mxu0  ;;  %1281 = vst.msk [vmem:[%s1901_s8 + $0x40] sm:$0xff] %vm686_vm1, %v1158_v46  ;;  %v990_v23 = vadd.f32 %v989_v0, %v923_v40  ;;  %v1074_v48 = vpop.f32.mrf.mxu2 }
 0x130   : > { %v1131_v2 = vpop.f32.mrf.mxu3  ;;  %v928_v53 = vadd.f32 %v927_v54, %v860_v7 }
 0x131   : > { %v1075_v19 = vadd.f32 %v1074_v48, %v990_v23 }
 0x133   : > { %v1132_v35 = vadd.f32 %v1131_v2, %v1075_v19 }
 0x135   : > { %v1159_v28 = vmul.f32 0.04, %v1132_v35 }
 0x136   : > { %v995_v33 = vpop.f32.mrf.mxu1 }
 0x137   : > { %v932_v57 = vpop.f32.mrf.mxu0  ;;  %1282 = vst.msk [vmem:[%s1901_s8 + $0x48] sm:$0xff] %vm686_vm1, %v1159_v28  ;;  %v996_v4 = vadd.f32 %v995_v33, %v928_v53  ;;  %v1078_v13 = vpop.f32.mrf.mxu2 }
 0x138   : > { %v1135_v31 = vpop.f32.mrf.mxu3  ;;  %v933_v49 = vadd.f32 %v932_v57, %v864_v6 }
 0x139   : > { %v1079_v58 = vadd.f32 %v1078_v13, %v996_v4 }
 0x13b   : > { %v1136_v15 = vadd.f32 %v1135_v31, %v1079_v58 }
 0x13d   : > { %v1160_v44 = vmul.f32 0.04, %v1136_v15 }
 0x13e   : > { %v1001_v12 = vpop.f32.mrf.mxu1 }
 0x13f   : > { %v937_v59 = vpop.f32.mrf.mxu0  ;;  %1283 = vst.msk [vmem:[%s1901_s8 + $0x50] sm:$0xff] %vm686_vm1, %v1160_v44  ;;  %v1002_v50 = vadd.f32 %v1001_v12, %v933_v49  ;;  %v1082_v10 = vpop.f32.mrf.mxu2 }
 0x140   : > { %v1139_v42 = vpop.f32.mrf.mxu3  ;;  %v938_v20 = vadd.f32 %v937_v59, %v868_v22 }
 0x141   : > { %v1083_v16 = vadd.f32 %v1082_v10, %v1002_v50 }
 0x143   : > { %v1140_v60 = vadd.f32 %v1139_v42, %v1083_v16 }
 0x145   : > { %v1161_v24 = vmul.f32 0.04, %v1140_v60 }
 0x146   : > { %v1007_v3 = vpop.f32.mrf.mxu1 }
 0x147   : > { %v942_v8 = vpop.f32.mrf.mxu0  ;;  %1284 = vst.msk [vmem:[%s1901_s8 + $0x58] sm:$0xff] %vm686_vm1, %v1161_v24  ;;  %v1008_v39 = vadd.f32 %v1007_v3, %v938_v20  ;;  %v1086_v45 = vpop.f32.mrf.mxu2 }
 0x148   : > { %v1143_v29 = vpop.f32.mrf.mxu3  ;;  %v943_v17 = vadd.f32 %v942_v8, %v872_v62 }
 0x149   : > { %v1087_v14 = vadd.f32 %v1086_v45, %v1008_v39 }
 0x14b   : > { %v1144_v30 = vadd.f32 %v1143_v29, %v1087_v14 }
 0x14d   : > { %v1162_v25 = vmul.f32 0.04, %v1144_v30 }
 0x14e   : > { %v1013_v61 = vpop.f32.mrf.mxu1 }
 0x14f   : > { %1285 = vst.msk [vmem:[%s1901_s8 + $0x60] sm:$0xff] %vm686_vm1, %v1162_v25  ;;  %v1014_v36 = vadd.f32 %v1013_v61, %v943_v17  ;;  %v1090_v34 = vpop.f32.mrf.mxu2  ;;  %v947_v18 = vpop.f32.mrf.mxu0 }
 0x150   : > { %v1147_v47 = vpop.f32.mrf.mxu3  ;;  %v948_v11 = vadd.f32 %v947_v18, %v876_v51 }
 0x151   : > { %v1091_v43 = vadd.f32 %v1090_v34, %v1014_v36 }
 0x153   : > { %v1148_v63 = vadd.f32 %v1147_v47, %v1091_v43 }
 0x155   : > { %v1163_v26 = vmul.f32 0.04, %v1148_v63 }
 0x156   : > { %v1019_v37 = vpop.f32.mrf.mxu1 }
 0x157   : > { %1286 = vst.msk [vmem:[%s1901_s8 + $0x68] sm:$0xff] %vm686_vm1, %v1163_v26  ;;  %v1020_v55 = vadd.f32 %v1019_v37, %v948_v11  ;;  %v1094_v9 = vpop.f32.mrf.mxu2  ;;  %v952_v56 = vpop.f32.mrf.mxu0 }
 0x158   : > { %v1151_v41 = vpop.f32.mrf.mxu3  ;;  %v953_v40 = vadd.f32 %v952_v56, %v880_v38 }
 0x159   : > { %v1095_v5 = vadd.f32 %v1094_v9, %v1020_v55 }
 0x15b   : > { %v1152_v1 = vadd.f32 %v1151_v41, %v1095_v5 }
 0x15d   : > { %v1164_v46 = vmul.f32 0.04, %v1152_v1 }
 0x15e   : > { %v1025_v21 = vpop.f32.mrf.mxu1 }
 0x15f   : > { %1287 = vst.msk [vmem:[%s1901_s8 + $0x70] sm:$0xff] %vm686_vm1, %v1164_v46  ;;  %v1026_v32 = vadd.f32 %v1025_v21, %v953_v40  ;;  %v1098_v54 = vpop.f32.mrf.mxu2 }
 0x160   : > { %v1155_v0 = vpop.f32.mrf.mxu3 }
 0x161   : > { %v1099_v23 = vadd.f32 %v1098_v54, %v1026_v32 }
 0x163   : > { %v1156_v48 = vadd.f32 %v1155_v0, %v1099_v23 }
 0x165   : > { %v1165_v2 = vmul.f32 0.04, %v1156_v48 }
 0x167   : > { %1288 = vst.msk [vmem:[%s1901_s8 + $0x78] sm:$0xff] %vm686_vm1, %v1165_v2 }
 0x168 PF: > { %s12_s11 = sadd.s32 1, %s1339_s11   ;;  %s2014_s9 = smov %s1335_s10 }
 0x169   : > { %p9_p5 = scmp.ge.s32.totalorder %s12_s11, 4   ;;  %s2015_s10 = smov %s2017_s12 }
 0x16b   :  { %11 = sbr.rel (!%p9_p5) target bundleno = 2 (0x2), region = 60 }

</bundles_post_ra>
